<compile_context>
chip_gen: v7x
topology: tpu7x:2x2x1
jax: 0.10.0
libtpu: 0.0.40
codegen_flags: <defaults>
</compile_context>

<pallas_src>
import functools

import jax
import jax.numpy as jnp
import numpy as np
from jax.experimental import pallas as pl
from jax.experimental.pallas import tpu as pltpu


_SGD_LO, _SGD_HI = 0.5, 0.73106        # range of sigmoid(exp(-d/(2*sigma^2)))
_EXP_SHIFT = 0.5 * (_SGD_LO + _SGD_HI)  # softmax shift (cancels in softmax)


# ----------------------------------------------------------------------------
# Kernel 1: per-node prep (tiled over node rows).
#   Sh   = softmax(s2(relu(s1(h))), dim=1)
#   p    = Sh @ W_m ,  q = p + b_m
#   paug = [-2p | 1 | ||p||^2] ,  qaug = [q | ||q||^2 | 1]
#   so that paug[v] . qaug[u] = ||q_u - p_v||^2 (one MXU matmul in kernel 2).
# ----------------------------------------------------------------------------
def _node_prep_kernel(h_ref, w_s1_ref, b_s1_ref, w_s2_ref, b_s2_ref,
                      w_m_ref, b_m_ref, sh_ref, paug_ref, qaug_ref):
    f32 = jnp.float32
    h = h_ref[...]                                                  # [t, Fin]

    s1 = jnp.dot(h, w_s1_ref[...], preferred_element_type=f32) + b_s1_ref[...]
    s1 = jnp.maximum(s1, 0.0)
    logits = jnp.dot(s1, w_s2_ref[...], preferred_element_type=f32) + b_s2_ref[...]
    logits = logits - jnp.max(logits, axis=1, keepdims=True)
    e = jnp.exp(logits)
    sh = e * (1.0 / jnp.sum(e, axis=1, keepdims=True))              # [t, A]
    sh_ref[...] = sh

    p = jnp.dot(sh, w_m_ref[...], preferred_element_type=f32)       # [t, A]
    q = p + b_m_ref[...]                                            # [t, A]
    ones = jnp.ones((h.shape[0], 1), f32)
    pn = jnp.sum(p * p, axis=1, keepdims=True)                      # [t, 1]
    qn = jnp.sum(q * q, axis=1, keepdims=True)                      # [t, 1]
    paug_ref[...] = jnp.concatenate([p * (-2.0), ones, pn], axis=1)  # [t, A+2]
    qaug_ref[...] = jnp.concatenate([q, qn, ones], axis=1)           # [t, A+2]


# ----------------------------------------------------------------------------
# Kernel 2: streamed edge features + softmax aggregation + NodeApply.
# Grid = (dst tiles [parallel], src chunks [arbitrary, reduction]).
#   sq[v,u] = ||q_u - p_v||^2 via the augmented Gram matmul (MXU, f32)
#   alpha   = softmax_u(sigmoid(exp(-sqrt(sq+eps)/(2*sigma^2)+eps)))
#   c[v]    = (1/N) sum_u alpha[v,u] h[u]        (streamed accumulation)
#   h_out   = h + relu(l2norm(h @ W_h + c @ W_c + b))
# ----------------------------------------------------------------------------
def _edge_agg_kernel(h_src_ref, qaugt_ref, h_dst_ref, paug_ref,
                     w_h_ref, w_c_ref, b_na_ref, out_ref,
                     denom_ref, cacc_ref, *, sigma, n_total, compute_dtype):
    f32 = jnp.float32
    j = pl.program_id(1)

    @pl.when(j == 0)
    def _():
        denom_ref[...] = jnp.zeros_like(denom_ref)
        cacc_ref[...] = jnp.zeros_like(cacc_ref)

    # ||q_u - p_v||^2 for this u-chunk: one NN MXU matmul (f32 accumulate).
    cross = jnp.dot(paug_ref[...], qaugt_ref[...],
                    preferred_element_type=f32)                     # [tv, tu]
    sq = jnp.maximum(cross, 0.0)                                    # fp-cancel clamp

    x = (sq + 1e-9).astype(compute_dtype)
    d = jnp.sqrt(x)                                                 # EUP
    gd = jnp.exp(d * (-1.0 / (2.0 * sigma ** 2)) + 1e-9)            # EUP
    sgd = 0.5 * (jnp.tanh(0.5 * gd) + 1.0)                          # EUP (1 push)

    # alpha numerator exp(sgd - shift) as a degree-4 polynomial on the VPU.
    # sgd is provably in (0.5, 0.7312); poly relative error < 2e-7.
    t = sgd - _EXP_SHIFT
    a = 1.0 + t * (1.0 + t * (0.5 + t * (1.0 / 6.0 + t * (1.0 / 24.0))))

    denom_ref[...] += jnp.sum(a.astype(f32), axis=1, keepdims=True)  # f32 sum
    cacc_ref[...] += jnp.dot(a, h_src_ref[...],
                             preferred_element_type=f32)            # [tv, Fin]

    @pl.when(j == pl.num_programs(1) - 1)
    def _():
        h_t = h_dst_ref[...]                                        # [tv, Fin]
        # softmax denominator and the 1/N mean folded into one reciprocal.
        inv = pl.reciprocal(denom_ref[...] * float(n_total), approx=True)
        c = cacc_ref[...] * inv                                     # [tv, Fin]
        bundle = (jnp.dot(h_t, w_h_ref[...], preferred_element_type=f32)
                  + jnp.dot(c, w_c_ref[...], preferred_element_type=f32)
                  + b_na_ref[...])                                  # [tv, Fout]
        ssq = jnp.sum(bundle * bundle, axis=1, keepdims=True)
        bundle = bundle * jax.lax.rsqrt(jnp.maximum(ssq, 1e-24))    # F.normalize
        bundle = jnp.maximum(bundle, 0.0)                           # ReLU
        out_ref[...] = h_t + bundle                                 # residual


# ----------------------------------------------------------------------------
# Tiling / generation helpers.
# ----------------------------------------------------------------------------
def _pick_tile_v(n):
    """Dst-node tile: multiple of 8 dividing n, preferring >=2 tiles so the
    'parallel' grid axis can split across v7x's two TensorCores."""
    if n <= 8:
        return n
    for t in (512, 256, 128, 64, 32, 16, 8):
        if t < n and n % t == 0:
            return t
    return n


def _pick_tile_u(n):
    """Src-node chunk (lane axis of the streamed score block): a multiple of
    128 dividing n (BlockSpec lane constraint), or all of n for small graphs."""
    if n % 128 != 0:
        return n
    for t in (1024, 512, 256, 128):
        if t <= n and n % t == 0:
            return t
    return n


def _default_bf16_transcendentals():
    # bf16 EUP/VPU exist on v6e / v7x; v5e (and older) stay f32.
    try:
        kind = jax.devices()[0].device_kind.lower()
    except Exception:
        return False
    return ("v6" in kind) or ("v7" in kind) or ("7x" in kind)


def _vmem_limit_bytes():
    # Generation-aware scoped-VMEM budget: ~3/4 of physical, capped; the
    # fallback (48 MiB) is safe even on v7x's 64 MiB of physical VMEM.
    # The streamed kernel needs far less than this regardless of N.
    try:
        cap = int(pltpu.get_tpu_info().vmem_capacity_bytes)
        return int(min(96 * 1024 * 1024, (cap * 3) // 4))
    except Exception:
        return 48 * 1024 * 1024


# ----------------------------------------------------------------------------
# Wrapper.
# ----------------------------------------------------------------------------
def bi_graphsage_layer(h, params, *, sigma=1.0, tile_v=None, tile_u=None,
                       use_bf16_transcendentals=None):
    n, fin = h.shape
    fout = params["w_s1"].shape[1]
    adim = params["w_s2"].shape[1]
    assert params["w_na"].shape == (2 * fin, fout)
    assert fin == fout, "residual path requires in_feats == out_feats"

    tv = _pick_tile_v(n) if tile_v is None else tile_v
    tu = _pick_tile_u(n) if tile_u is None else tile_u
    assert n % tv == 0 and (tv % 8 == 0 or tv == n)
    assert n % tu == 0 and (tu % 128 == 0 or tu == n)

    if use_bf16_transcendentals is None:
        use_bf16_transcendentals = _default_bf16_transcendentals()
    compute_dtype = jnp.bfloat16 if use_bf16_transcendentals else jnp.float32

    # Host-side split of the NodeApply weight (no in-kernel slicing).
    w_h = params["w_na"][:fin, :]
    w_c = params["w_na"][fin:, :]

    vmem_limit = _vmem_limit_bytes()
    cparams1 = pltpu.CompilerParams(dimension_semantics=("parallel",),
                                    vmem_limit_bytes=vmem_limit)
    cparams2 = pltpu.CompilerParams(dimension_semantics=("parallel", "arbitrary"),
                                    vmem_limit_bytes=vmem_limit)

    # ---- kernel 1: per-node prep ------------------------------------------
    row = lambda i: (i, 0)
    whole = lambda i: (0, 0)
    sh, paug, qaug = pl.pallas_call(
        _node_prep_kernel,
        out_shape=(jax.ShapeDtypeStruct((n, adim), jnp.float32),
                   jax.ShapeDtypeStruct((n, adim + 2), jnp.float32),
                   jax.ShapeDtypeStruct((n, adim + 2), jnp.float32)),
        grid=(n // tv,),
        in_specs=[
            pl.BlockSpec((tv, fin), row),          # h rows
            pl.BlockSpec((fin, fout), whole),      # w_s1
            pl.BlockSpec((1, fout), whole),        # b_s1
            pl.BlockSpec((fout, adim), whole),     # w_s2
            pl.BlockSpec((1, adim), whole),        # b_s2
            pl.BlockSpec((adim, adim), whole),     # w_metric
            pl.BlockSpec((1, adim), whole),        # b_metric
        ],
        out_specs=(pl.BlockSpec((tv, adim), row),
                   pl.BlockSpec((tv, adim + 2), row),
                   pl.BlockSpec((tv, adim + 2), row)),
        compiler_params=cparams1,
    )(h, params["w_s1"], params["b_s1"], params["w_s2"], params["b_s2"],
      params["w_metric"], params["b_metric"])

    # One small transpose outside the kernels so the Gram matmul in kernel 2
    # is a plain NN matmul (src u on lanes; no per-chunk transpose/relayout).
    qaug_t = jnp.transpose(qaug)                       # [A+2, N]
    h_src = h.astype(compute_dtype)                    # streamed src rows

    # ---- kernel 2: streamed edge scores + aggregation + NodeApply ----------
    n_v = n // tv
    src_bytes = 2 if compute_dtype == jnp.bfloat16 else 4
    cost = pl.CostEstimate(
        flops=int(2 * n * n * (adim + 2) + 2 * n * n * fin + 18 * n * n
                  + 4 * n * fin * fout),
        transcendentals=int(3 * n * n),                # sqrt, exp, tanh / edge
        bytes_accessed=int(n_v * n * (fin * src_bytes + (adim + 2) * 4)
                           + n * (2 * fin + adim + 2 + fout) * 4
                           + (2 * fin + 1) * fout * 4))

    dst_tile = lambda i, j: (i, 0)
    src_rows = lambda i, j: (j, 0)
    src_cols = lambda i, j: (0, j)
    whole2 = lambda i, j: (0, 0)

    h_out = pl.pallas_call(
        functools.partial(_edge_agg_kernel, sigma=float(sigma), n_total=n,
                          compute_dtype=compute_dtype),
        out_shape=jax.ShapeDtypeStruct((n, fout), jnp.float32),
        grid=(n // tv, n // tu),
        in_specs=[
            pl.BlockSpec((tu, fin), src_rows),         # h   (src chunk)
            pl.BlockSpec((adim + 2, tu), src_cols),    # qaug^T (src chunk)
            pl.BlockSpec((tv, fin), dst_tile),         # h   (dst rows)
            pl.BlockSpec((tv, adim + 2), dst_tile),    # paug (dst rows)
            pl.BlockSpec((fin, fout), whole2),         # W_h
            pl.BlockSpec((fin, fout), whole2),         # W_c
            pl.BlockSpec((1, fout), whole2),           # b_na
        ],
        out_specs=pl.BlockSpec((tv, fout), dst_tile),
        scratch_shapes=[pltpu.VMEM((tv, 1), jnp.float32),     # softmax denom
                        pltpu.VMEM((tv, fin), jnp.float32)],  # c numerator
        compiler_params=cparams2,
        cost_estimate=cost,
    )(h_src, qaug_t, h, paug, w_h, w_c, params["b_na"])

    return h_out, sh


# ----------------------------------------------------------------------------
# Plain-JAX reference of the same forward pass (dense complete graph).
# ----------------------------------------------------------------------------
def reference(h, params, sigma):
    s1 = jax.nn.relu(h @ params["w_s1"] + params["b_s1"])
    sh = jax.nn.softmax(s1 @ params["w_s2"] + params["b_s2"], axis=1)
    sd = sh[:, None, :] - sh[None, :, :]                            # [u, v, a]
    sdh = sd @ params["w_metric"] + params["b_metric"]
    d = jnp.sqrt(jnp.sum(sdh * sdh, axis=-1) + 1e-9)
    gd = jnp.exp(-d / (2.0 * sigma ** 2) + 1e-9)
    sgd = jax.nn.sigmoid(gd)
    alpha = jax.nn.softmax(sgd, axis=0)                             # over src u
    c = (alpha.T @ h) / h.shape[0]
    bundle = jnp.concatenate([h, c], axis=1) @ params["w_na"] + params["b_na"]
    norm = jnp.sqrt(jnp.sum(bundle * bundle, axis=1, keepdims=True))
    bundle = jax.nn.relu(bundle / jnp.maximum(norm, 1e-12))
    return h + bundle, sh


if __name__ == "__main__":
    SIGMA = 1.0

    def linear_init(kw, kb, fan_in, fan_out):
        # mirrors nn.Linear default init; weight stored pre-transposed [in, out]
        bound = 1.0 / np.sqrt(fan_in)
        w = jax.random.uniform(kw, (fan_in, fan_out), jnp.float32, -bound, bound)
        b = jax.random.uniform(kb, (1, fan_out), jnp.float32, -bound, bound)
        return w, b

    def make_case(key, n, fin, fout, adim):
        keys = jax.random.split(key, 9)
        w_s1, b_s1 = linear_init(keys[0], keys[1], fin, fout)
        w_s2, b_s2 = linear_init(keys[2], keys[3], fout, adim)
        w_m, b_m = linear_init(keys[4], keys[5], adim, adim)
        w_na, b_na = linear_init(keys[6], keys[7], 2 * fin, fout)
        params = dict(w_s1=w_s1, b_s1=b_s1, w_s2=w_s2, b_s2=b_s2,
                      w_metric=w_m, b_metric=b_m, w_na=w_na, b_na=b_na)
        h = jax.random.normal(keys[8], (n, fin), jnp.float32)
        return h, params

    key = jax.random.PRNGKey(0)
    k1, k2 = jax.random.split(key)

    # Case 1: tiny module-consistent shapes (single v-tile, single u-chunk).
    h, params = make_case(k1, 8, 32, 32, 16)
    out, sh = bi_graphsage_layer(h, params, sigma=SIGMA)
    jax.block_until_ready((out, sh))
    ref_out, ref_sh = reference(h, params, SIGMA)
    np.testing.assert_allclose(np.asarray(out), np.asarray(ref_out),
                               rtol=1e-3, atol=1e-3)
    np.testing.assert_allclose(np.asarray(sh), np.asarray(ref_sh),
                               rtol=1e-3, atol=1e-3)

    # Case 2: default tiling (2 parallel dst tiles of 128, one u-chunk of 256).
    h2, params2 = make_case(k2, 256, 64, 64, 16)
    ref_out2, ref_sh2 = reference(h2, params2, SIGMA)
    out2, sh2 = bi_graphsage_layer(h2, params2, sigma=SIGMA)
    jax.block_until_ready((out2, sh2))
    np.testing.assert_allclose(np.asarray(out2), np.asarray(ref_out2),
                               rtol=1e-3, atol=1e-3)
    np.testing.assert_allclose(np.asarray(sh2), np.asarray(ref_sh2),
                               rtol=1e-3, atol=1e-3)

    # Case 3: exercises the streamed u axis (4 dst tiles x 2 u-chunks of 128),
    # i.e. the cross-step accumulation of the softmax denominator and c.
    out3, sh3 = bi_graphsage_layer(h2, params2, sigma=SIGMA,
                                   tile_v=64, tile_u=128)
    jax.block_until_ready((out3, sh3))
    np.testing.assert_allclose(np.asarray(out3), np.asarray(ref_out2),
                               rtol=1e-3, atol=1e-3)
    np.testing.assert_allclose(np.asarray(sh3), np.asarray(ref_sh2),
                               rtol=1e-3, atol=1e-3)

    print("KERNEL_OK")
</pallas_src>

<mosaic_0001>
module attributes {stable_mosaic.version = 11 : i64} {
  func.func @_node_prep_kernel(%arg0: i32, %arg1: memref<8x32xf32, #tpu.memory_space<vmem>>, %arg2: memref<32x32xf32, #tpu.memory_space<vmem>>, %arg3: memref<1x32xf32, #tpu.memory_space<vmem>>, %arg4: memref<32x16xf32, #tpu.memory_space<vmem>>, %arg5: memref<1x16xf32, #tpu.memory_space<vmem>>, %arg6: memref<16x16xf32, #tpu.memory_space<vmem>>, %arg7: memref<1x16xf32, #tpu.memory_space<vmem>>, %arg8: memref<8x16xf32, #tpu.memory_space<vmem>>, %arg9: memref<8x18xf32, #tpu.memory_space<vmem>>, %arg10: memref<8x18xf32, #tpu.memory_space<vmem>>) attributes {dimension_semantics = [#tpu.dimension_semantics<parallel>], iteration_bounds = array<i64: 1>, scalar_prefetch = 0 : i64, scratch_operands = 0 : i64, tpu.core_type = #tpu.core_type<tc>, window_params = [{transform_indices = @transform_0, window_bounds = array<i64: 8, 32>}, {pipeline_mode = #tpu.pipeline_mode<synchronous>, transform_indices = @transform_1, window_bounds = array<i64: 32, 32>}, {pipeline_mode = #tpu.pipeline_mode<synchronous>, transform_indices = @transform_2, window_bounds = array<i64: 1, 32>}, {pipeline_mode = #tpu.pipeline_mode<synchronous>, transform_indices = @transform_3, window_bounds = array<i64: 32, 16>}, {pipeline_mode = #tpu.pipeline_mode<synchronous>, transform_indices = @transform_4, window_bounds = array<i64: 1, 16>}, {pipeline_mode = #tpu.pipeline_mode<synchronous>, transform_indices = @transform_5, window_bounds = array<i64: 16, 16>}, {pipeline_mode = #tpu.pipeline_mode<synchronous>, transform_indices = @transform_6, window_bounds = array<i64: 1, 16>}, {transform_indices = @transform_7, window_bounds = array<i64: 8, 16>}, {transform_indices = @transform_8, window_bounds = array<i64: 8, 18>}, {transform_indices = @transform_9, window_bounds = array<i64: 8, 18>}]} {
    %c0 = arith.constant 0 : index
    %c0_0 = arith.constant 0 : index
    %0 = vector.load %arg1[%c0, %c0_0] : memref<8x32xf32, #tpu.memory_space<vmem>>, vector<8x32xf32>
    %c0_1 = arith.constant 0 : index
    %c0_2 = arith.constant 0 : index
    %1 = vector.load %arg2[%c0_1, %c0_2] : memref<32x32xf32, #tpu.memory_space<vmem>>, vector<32x32xf32>
    %cst = arith.constant dense<0.000000e+00> : vector<8x32xf32>
    %2 = tpu.matmul %0, %1, %cst {dimension_numbers = #tpu.dot_dimension_numbers<[1], [0], [0], [1], [0, 0, 1, 1], [], []>} : vector<8x32xf32>, vector<32x32xf32>, vector<8x32xf32> -> vector<8x32xf32>
    %c0_3 = arith.constant 0 : index
    %c0_4 = arith.constant 0 : index
    %3 = vector.load %arg3[%c0_3, %c0_4] : memref<1x32xf32, #tpu.memory_space<vmem>>, vector<1x32xf32>
    %4 = vector.broadcast %3 : vector<1x32xf32> to vector<8x32xf32>
    %5 = arith.addf %2, %4 : vector<8x32xf32>
    %cst_5 = arith.constant 0.000000e+00 : f32
    %6 = vector.broadcast %cst_5 : f32 to vector<8x32xf32>
    %7 = arith.maximumf %5, %6 : vector<8x32xf32>
    %c0_6 = arith.constant 0 : index
    %c0_7 = arith.constant 0 : index
    %8 = vector.load %arg4[%c0_6, %c0_7] : memref<32x16xf32, #tpu.memory_space<vmem>>, vector<32x16xf32>
    %cst_8 = arith.constant dense<0.000000e+00> : vector<8x16xf32>
    %9 = tpu.matmul %7, %8, %cst_8 {dimension_numbers = #tpu.dot_dimension_numbers<[1], [0], [0], [1], [0, 0, 1, 1], [], []>} : vector<8x32xf32>, vector<32x16xf32>, vector<8x16xf32> -> vector<8x16xf32>
    %c0_9 = arith.constant 0 : index
    %c0_10 = arith.constant 0 : index
    %10 = vector.load %arg5[%c0_9, %c0_10] : memref<1x16xf32, #tpu.memory_space<vmem>>, vector<1x16xf32>
    %11 = vector.broadcast %10 : vector<1x16xf32> to vector<8x16xf32>
    %12 = arith.addf %9, %11 : vector<8x16xf32>
    %cst_11 = arith.constant dense<0xFF800000> : vector<8xf32>
    %13 = vector.multi_reduction <maximumf>, %12, %cst_11 [1] : vector<8x16xf32> to vector<8xf32>
    %14 = vector.shape_cast %13 : vector<8xf32> to vector<8x1xf32>
    %15 = vector.broadcast %14 : vector<8x1xf32> to vector<8x16xf32>
    %16 = arith.subf %12, %15 : vector<8x16xf32>
    %17 = math.exp %16 : vector<8x16xf32>
    %cst_12 = arith.constant dense<0.000000e+00> : vector<8xf32>
    %18 = vector.multi_reduction <add>, %17, %cst_12 [1] : vector<8x16xf32> to vector<8xf32>
    %19 = vector.shape_cast %18 : vector<8xf32> to vector<8x1xf32>
    %cst_13 = arith.constant 1.000000e+00 : f32
    %20 = vector.broadcast %cst_13 : f32 to vector<8x1xf32>
    %21 = arith.divf %20, %19 : vector<8x1xf32>
    %22 = vector.broadcast %21 : vector<8x1xf32> to vector<8x16xf32>
    %23 = arith.mulf %17, %22 : vector<8x16xf32>
    %c0_14 = arith.constant 0 : index
    %c0_15 = arith.constant 0 : index
    %24 = vector.load %arg8[%c0_14, %c0_15] : memref<8x16xf32, #tpu.memory_space<vmem>>, vector<8x16xf32>
    tpu.vector_store %arg8[%c0_14, %c0_15], %23 {strides = array<i32>} : memref<8x16xf32, #tpu.memory_space<vmem>>, vector<8x16xf32>,
    %c0_16 = arith.constant 0 : index
    %c0_17 = arith.constant 0 : index
    %25 = vector.load %arg6[%c0_16, %c0_17] : memref<16x16xf32, #tpu.memory_space<vmem>>, vector<16x16xf32>
    %cst_18 = arith.constant dense<0.000000e+00> : vector<8x16xf32>
    %26 = tpu.matmul %23, %25, %cst_18 {dimension_numbers = #tpu.dot_dimension_numbers<[1], [0], [0], [1], [0, 0, 1, 1], [], []>} : vector<8x16xf32>, vector<16x16xf32>, vector<8x16xf32> -> vector<8x16xf32>
    %c0_19 = arith.constant 0 : index
    %c0_20 = arith.constant 0 : index
    %27 = vector.load %arg7[%c0_19, %c0_20] : memref<1x16xf32, #tpu.memory_space<vmem>>, vector<1x16xf32>
    %28 = vector.broadcast %27 : vector<1x16xf32> to vector<8x16xf32>
    %29 = arith.addf %26, %28 : vector<8x16xf32>
    %cst_21 = arith.constant 1.000000e+00 : f32
    %30 = vector.broadcast %cst_21 : f32 to vector<8x1xf32>
    %31 = arith.mulf %26, %26 : vector<8x16xf32>
    %cst_22 = arith.constant dense<0.000000e+00> : vector<8xf32>
    %32 = vector.multi_reduction <add>, %31, %cst_22 [1] : vector<8x16xf32> to vector<8xf32>
    %33 = vector.shape_cast %32 : vector<8xf32> to vector<8x1xf32>
    %34 = arith.mulf %29, %29 : vector<8x16xf32>
    %cst_23 = arith.constant dense<0.000000e+00> : vector<8xf32>
    %35 = vector.multi_reduction <add>, %34, %cst_23 [1] : vector<8x16xf32> to vector<8xf32>
    %36 = vector.shape_cast %35 : vector<8xf32> to vector<8x1xf32>
    %cst_24 = arith.constant -2.000000e+00 : f32
    %37 = vector.broadcast %cst_24 : f32 to vector<8x16xf32>
    %38 = arith.mulf %26, %37 : vector<8x16xf32>
    %39 = tpu.concatenate %38, %30, %33 in 1 : vector<8x16xf32>, vector<8x1xf32>, vector<8x1xf32> -> vector<8x18xf32>
    %c0_25 = arith.constant 0 : index
    %c0_26 = arith.constant 0 : index
    %40 = vector.load %arg9[%c0_25, %c0_26] : memref<8x18xf32, #tpu.memory_space<vmem>>, vector<8x18xf32>
    tpu.vector_store %arg9[%c0_25, %c0_26], %39 {strides = array<i32>} : memref<8x18xf32, #tpu.memory_space<vmem>>, vector<8x18xf32>,
    %41 = tpu.concatenate %29, %36, %30 in 1 : vector<8x16xf32>, vector<8x1xf32>, vector<8x1xf32> -> vector<8x18xf32>
    %c0_27 = arith.constant 0 : index
    %c0_28 = arith.constant 0 : index
    %42 = vector.load %arg10[%c0_27, %c0_28] : memref<8x18xf32, #tpu.memory_space<vmem>>, vector<8x18xf32>
    tpu.vector_store %arg10[%c0_27, %c0_28], %41 {strides = array<i32>} : memref<8x18xf32, #tpu.memory_space<vmem>>, vector<8x18xf32>,
    return
  }
  func.func @transform_0(%arg0: i32) -> (i32, i32) {
    %c0_i32 = arith.constant 0 : i32
    %c0_i32_0 = arith.constant 0 : i32
    return %arg0, %c0_i32 : i32, i32
  }
  func.func @transform_1(%arg0: i32) -> (i32, i32) {
    %c0_i32 = arith.constant 0 : i32
    %c0_i32_0 = arith.constant 0 : i32
    %c0_i32_1 = arith.constant 0 : i32
    return %c0_i32, %c0_i32_0 : i32, i32
  }
  func.func @transform_2(%arg0: i32) -> (i32, i32) {
    %c0_i32 = arith.constant 0 : i32
    %c0_i32_0 = arith.constant 0 : i32
    %c0_i32_1 = arith.constant 0 : i32
    return %c0_i32, %c0_i32_0 : i32, i32
  }
  func.func @transform_3(%arg0: i32) -> (i32, i32) {
    %c0_i32 = arith.constant 0 : i32
    %c0_i32_0 = arith.constant 0 : i32
    %c0_i32_1 = arith.constant 0 : i32
    return %c0_i32, %c0_i32_0 : i32, i32
  }
  func.func @transform_4(%arg0: i32) -> (i32, i32) {
    %c0_i32 = arith.constant 0 : i32
    %c0_i32_0 = arith.constant 0 : i32
    %c0_i32_1 = arith.constant 0 : i32
    return %c0_i32, %c0_i32_0 : i32, i32
  }
  func.func @transform_5(%arg0: i32) -> (i32, i32) {
    %c0_i32 = arith.constant 0 : i32
    %c0_i32_0 = arith.constant 0 : i32
    %c0_i32_1 = arith.constant 0 : i32
    return %c0_i32, %c0_i32_0 : i32, i32
  }
  func.func @transform_6(%arg0: i32) -> (i32, i32) {
    %c0_i32 = arith.constant 0 : i32
    %c0_i32_0 = arith.constant 0 : i32
    %c0_i32_1 = arith.constant 0 : i32
    return %c0_i32, %c0_i32_0 : i32, i32
  }
  func.func @transform_7(%arg0: i32) -> (i32, i32) {
    %c0_i32 = arith.constant 0 : i32
    %c0_i32_0 = arith.constant 0 : i32
    return %arg0, %c0_i32 : i32, i32
  }
  func.func @transform_8(%arg0: i32) -> (i32, i32) {
    %c0_i32 = arith.constant 0 : i32
    %c0_i32_0 = arith.constant 0 : i32
    return %arg0, %c0_i32 : i32, i32
  }
  func.func @transform_9(%arg0: i32) -> (i32, i32) {
    %c0_i32 = arith.constant 0 : i32
    %c0_i32_0 = arith.constant 0 : i32
    return %arg0, %c0_i32 : i32, i32
  }
}

</mosaic_0001>

<bundles_post_ra>
// kernel: tpu_custom_call.1
= control target key start
LH: loop header
LB: loop body
LE: loop exit
PB: predicated region body
PF: predicated region fallthrough
CT: control target
= control target key end

     0   :  { %15 = vsyncpa [#allocation3], 0  ;;  %s697_s0 = inlined_call_operand.hbm [shape: f32[8,32], index: 0, kind: input, shape index: {}]   ;;  %s698_s1 = inlined_call_operand.vmem [shape: f32[32,32], index: 1, kind: input, shape index: {}]   ;;  %s699_s2 = inlined_call_operand.vmem [shape: f32[1,32], index: 2, kind: input, shape index: {}]   ;;  %s700_s3 = inlined_call_operand.vmem [shape: f32[32,16], index: 3, kind: input, shape index: {}]   ;;  %s701_s4 = inlined_call_operand.vmem [shape: f32[1,16], index: 4, kind: input, shape index: {}]   ;;  %s702_s5 = inlined_call_operand.vmem [shape: f32[16,16], index: 5, kind: input, shape index: {}]   ;;  %s703_s6 = inlined_call_operand.vmem [shape: f32[1,16], index: 6, kind: input, shape index: {}]   ;;  %s704_s7 = inlined_call_operand.hbm [shape: f32[8,16], index: 7, kind: output, shape index: {0}]   ;;  %s705_s8 = inlined_call_operand.hbm [shape: f32[8,18], index: 8, kind: output, shape index: {1}]   ;;  %s706_s9 = inlined_call_operand.hbm [shape: f32[8,18], index: 9, kind: output, shape index: {2}]  }
   0x1   :  { %16 = vsyncpa [#allocation4], 0 }
   0x2   :  { %17 = vsyncpa [#allocation7], 0  ;;  %s538_s30 = smov [#allocation2]   ;;  %s444_s13 = scalar_lea.hbm %s697_s0, 128 }
   0x3   :  { %s24_s10 = sshll.u32 %s538_s30, 4  ;;  %p445_p0 = scmp.ne.s32.totalorder %s697_s0, %s444_s13  ;;  %s25_s10 = int_to_ptr.vmem [resolvable:$true] %s24_s10 }
   0x4   :  { %p448_p1 = scmp.lt.u32.totalorder %s444_s13, %s697_s0 }
   0x6   :  { %p450_p2 = pnand %p448_p1, %p445_p0 }
   0x8   :  { %453 = shalt.err (!%p450_p2)
}
   0x9   :  { %s454_s18 = scalar_lea.vmem %s25_s10, 128  ;;  %p459_p4 = scmp.lt.s32.totalorder %s25_s10, %s25_s10 }
   0xa   :  { %p455_p3 = scmp.ne.s32.totalorder %s25_s10, %s454_s18  ;;  %p460_p5 = scmp.lt.s32.totalorder %s454_s18, %s454_s18 }
   0xc   :  { %p461_p6 = por %p460_p5, %p459_p4 }
   0xe   :  { %p462_p7 = pnand %p461_p6, %p455_p3 }
  0x10   :  { %465 = shalt.err (!%p462_p7)
}
  0x11   :  { %27 = dma.hbm_to_vmem [thread:$0]  %s697_s0, 128, %s25_s10, [#allocation3]  }
  0x12   :  { %532 = dma.done.wait [#allocation3], 128  }
  0x13   :  { %533 = vsyncadd [#allocation3], 4294967168  ;;  %v539_v0 = vmov 0.0|0.0   ;;  %vm540_vm0 = vmmov 0   ;;  %v541_v1 = vmov 0.0   ;;  %v44_v2 = vld [vmem:[%s698_s1] sm:$0xff] }
  0x14   :  { %418 = vmatprep.subr.bf16.mxu0 %v539_v0  ;;  %397 = vmatprep.mubr.msk.f32.mxu0 %vm540_vm0, %v541_v1  ;;  %v45_v3 = vld [vmem:[%s698_s1 + $0x8] sm:$0xff]  ;;  %v46_v4 = vld [vmem:[%s698_s1 + $0x10] sm:$0xff]  ;;  %v47_v6 = vld [vmem:[%s698_s1 + $0x18] sm:$0xff]  ;;  %vm55_vm1 = vcmask 261120   ;;  %vm214_vm2 = vcmask 130048  }
  0x15   :  { %424 = vmatprep.subr.bf16.mxu1 %v539_v0  ;;  %408 = vmatprep.mubr.msk.f32.mxu1 %vm540_vm0, %v541_v1  ;;  %v419_v5 = vpack.c.bf16 %v45_v3, %v44_v2  ;;  %v130_v7 = vld [vmem:[%s700_s3] sm:$0xff]  ;;  %v131_v8 = vld [vmem:[%s700_s3 + $0x8] sm:$0xff]  ;;  %v422_v9 = vpack.c.bf16 %v47_v6, %v46_v4  ;;  %v132_v12 = vld [vmem:[%s700_s3 + $0x10] sm:$0xff] }
  0x16   :  { %v425_v10 = vpack.c.bf16 %v131_v8, %v130_v7  ;;  %v43_v11 = vld [vmem:[#allocation2] sm:$0xff]  ;;  %v133_v13 = vld [vmem:[%s700_s3 + $0x18] sm:$0xff]  ;;  %v229_v31 = vld [vmem:[%s702_s5 + $0x8] sm:$0xff] }
  0x17   :  { %420 = vmatpush3.bf16.msra.mxu0 %v419_v5  ;;  %v428_v14 = vpack.c.bf16 %v133_v13, %v132_v12  ;;  %v370_v15 = vld [vmem:[%s699_s2] ss:$0 sm:$0xff] }
  0x18   :  { %421 = vmatprep.subr.bf16.mxu0 %v539_v0  ;;  %426 = vmatpush3.bf16.msra.mxu1 %v425_v10  ;;  %v372_v20 = vld [vmem:[%s701_s4] ss:$0 sm:$0xff] }
  0x19   :  { %427 = vmatprep.subr.bf16.mxu1 %v539_v0  ;;  %v228_v30 = vld [vmem:[%s702_s5] sm:$0xff]  ;;  %s542_s5 = smov [#allocation5]  }
  0x1a   :  { %v431_v32 = vpack.c.bf16 %v229_v31, %v228_v30  ;;  %v375_v36 = vld [vmem:[%s703_s6] ss:$0 sm:$0xff]  ;;  %s334_s21 = sshll.u32 %s542_s5, 4  ;;  %s335_s21 = int_to_ptr.vmem [resolvable:$true] %s334_s21 }
  0x1b   :  { %423 = vmatpush3.bf16.msra.mxu0 %v422_v9  ;;  %s466_s22 = scalar_lea.vmem %s335_s21, 128  ;;  %p471_p9 = scmp.lt.s32.totalorder %s335_s21, %s335_s21 }
  0x1c   :  { %430 = vmatprep.subr.bf16.mxu0 %v539_v0  ;;  %429 = vmatpush3.bf16.msra.mxu1 %v428_v14  ;;  %p467_p8 = scmp.ne.s32.totalorder %s335_s21, %s466_s22  ;;  %p472_p10 = scmp.lt.s32.totalorder %s466_s22, %s466_s22 }
  0x1e   :  { %398 = vmatmul.mubr.msk.f32.vlgmr.msra.gmra.mrb[0].mxu0 %vm55_vm1, %v43_v11  ;;  %p473_p11 = por %p472_p10, %p471_p9 }
  0x1f   :  { %415 = vmatprep.mubr.msk.f32.mxu0 %vm540_vm0, %v541_v1  ;;  %432 = vmatpush3.bf16.msra.mxu0 %v431_v32 }
  0x20   :  { %p474_p12 = pnand %p473_p11, %p467_p8 }
  0xf1   :  { %v125_v16 = vpop.f32.mrb[0].mxu0 }
  0xf2   :  { %v126_v17 = vadd.f32 %v370_v15, %v125_v16  ;;  %v399_v18 = vpop.f32.mrb[1].mxu0 }
  0xf4   :  { %v129_v19 = vmax.f32 %v126_v17, 0.0 }
  0xf6   :  { %409 = vmatmul.mubr.msk.f32.vlgmr.msra.gmra.mrb[0].mxu1 %vm55_vm1, %v129_v19 }
 0x1c9   :  { %v210_v21 = vpop.f32.mrb[0].mxu1 }
 0x1ca   :  { %v211_v22 = vadd.f32 %v372_v20, %v210_v21  ;;  %v410_v23 = vpop.f32.mrb[1].mxu1 }
 0x1cc   :  { %v215_v24 = vsel %vm214_vm2, %v211_v22, -inf }
 0x1cd   :  { %216 = vmax.xlane.f32.xlu0 %v215_v24 }
 0x25a   :  { %v217_v25 = vpop.xlane.xlu0 %216 }
 0x25b   :  { %v218_v26 = vsub.f32 %v211_v22, %v217_v25 }
 0x25d   :  { %v219_v27 = vmul.f32 1.442695, %v218_v26 }
 0x25f   :  { %440 = vpow2.f32 %v219_v27 }
 0x269   :  { %v441_v28 = vpop.eup %440 }
 0x26a   :  { %v221_v29 = vsel %vm214_vm2, %v441_v28, 0.0 }
 0x26b   :  { %222 = vadd.xlane.f32.xlu0 %v221_v29 }
 0x2f8   :  { %v223_v33 = vpop.xlane.xlu0 %222 }
 0x2f9   :  { %442 = vrcp.f32 %v223_v33 }
 0x303   :  { %v443_v34 = vpop.eup %442 }
 0x304   :  { %v226_v35 = vmul.f32 %v443_v34, %v441_v28 }
 0x306   :  { %227 = vst.msk [vmem:[#allocation5] sm:$0xff] %vm214_vm2, %v226_v35  ;;  %416 = vmatmul.mubr.msk.f32.vlgmr.msra.gmra.mrb[2].mxu0 %vm214_vm2, %v226_v35 }
 0x3d9   :  { %v299_v37 = vpop.f32.mrb[2].mxu0 }
 0x3da   :  { %v310_v38 = vadd.f32 %v375_v36, %v299_v37  ;;  %v417_v39 = vpop.f32.mrb[3].mxu0  ;;  %v311_v40 = vmul.f32 %v299_v37, %v299_v37 }
 0x3dc   :  { %v312_v41 = vsel %vm214_vm2, %v311_v40, 0.0  ;;  %v315_v42 = vmul.f32 %v310_v38, %v310_v38 }
 0x3dd   :  { %313 = vadd.xlane.f32.xlu1 %v312_v41 }
 0x3de   :  { %v316_v43 = vsel %vm214_vm2, %v315_v42, 0.0 }
 0x3e1   :  { %317 = vadd.xlane.f32.xlu1 %v316_v43 }
 0x3e2   :  { %477 = shalt.err (!%p474_p12)
}
 0x3e3   :  { %s478_s24 = scalar_lea.hbm %s704_s7, 128 }
 0x3e4   :  { %p479_p13 = scmp.ne.s32.totalorder %s704_s7, %s478_s24  ;;  %p482_p0 = scmp.lt.u32.totalorder %s478_s24, %s704_s7 }
 0x3e6   :  { %p484_p1 = pnand %p482_p0, %p479_p13 }
 0x3e8   :  { %487 = shalt.err (!%p484_p1)
}
 0x3e9   :  { %337 = dma.vmem_to_hbm [thread:$0]  %s335_s21, 128, %s704_s7, [#allocation4]   ;;  %v319_v44 = vmul.f32 -2.0, %v299_v37  ;;  %vm321_vm3 = vcmask 138240   ;;  %vm323_vm4 = vcmask 146432  }
 0x3ea   :  { %s543_s30 = smov [#allocation6]   ;;  %s544_s1 = smov [#allocation8]  }
 0x3eb   :  { %s344_s10 = sshll.u32 %s543_s30, 4  ;;  %v320_v45 = vsel %vm214_vm2, %v319_v44, 1.0  ;;  %s354_s11 = sshll.u32 %s544_s1, 4  ;;  %s345_s10 = int_to_ptr.vmem [resolvable:$true] %s344_s10  ;;  %s355_s11 = int_to_ptr.vmem [resolvable:$true] %s354_s11 }
 0x3ec   :  { %s488_s12 = scalar_lea.vmem %s345_s10, 128  ;;  %p493_p3 = scmp.lt.s32.totalorder %s345_s10, %s345_s10 }
 0x3ed   :  { %p489_p2 = scmp.ne.s32.totalorder %s345_s10, %s488_s12  ;;  %p494_p4 = scmp.lt.s32.totalorder %s488_s12, %s488_s12 }
 0x3ef   :  { %p495_p5 = por %p494_p4, %p493_p3 }
 0x3f1   :  { %p496_p6 = pnand %p495_p5, %p489_p2 }
 0x46a   :  { %v314_v46 = vpop.xlane.xlu1 %313 }
 0x46b   :  { %v322_v47 = vsel %vm321_vm3, %v320_v45, %v314_v46 }
 0x46c   :  { %324 = vst.msk [vmem:[#allocation6] sm:$0xff] %vm323_vm4, %v322_v47 }
 0x46d   :  { %499 = shalt.err (!%p496_p6)
}
 0x46e   :  { %s500_s14 = scalar_lea.hbm %s705_s8, 128 }
 0x46f   :  { %p501_p7 = scmp.ne.s32.totalorder %s705_s8, %s500_s14  ;;  %p504_p8 = scmp.lt.u32.totalorder %s500_s14, %s705_s8 }
 0x471   :  { %p506_p9 = pnand %p504_p8, %p501_p7 }
 0x473   :  { %509 = shalt.err (!%p506_p9)
}
 0x474   :  { %347 = dma.vmem_to_hbm [thread:$0]  %s345_s10, 128, %s705_s8, [#allocation7]   ;;  %v318_v48 = vpop.xlane.xlu1 %317 }
 0x475   :  { %v325_v49 = vsel %vm214_vm2, %v310_v38, %v318_v48  ;;  %s510_s18 = scalar_lea.vmem %s355_s11, 128  ;;  %p515_p11 = scmp.lt.s32.totalorder %s355_s11, %s355_s11 }
 0x476   :  { %v326_v50 = vsel %vm321_vm3, %v325_v49, 1.0  ;;  %p511_p10 = scmp.ne.s32.totalorder %s355_s11, %s510_s18  ;;  %p516_p12 = scmp.lt.s32.totalorder %s510_s18, %s510_s18 }
 0x477   :  { %327 = vst.msk [vmem:[#allocation8] sm:$0xff] %vm323_vm4, %v326_v50 }
 0x478   :  { %p517_p13 = por %p516_p12, %p515_p11 }
 0x47a   :  { %p518_p0 = pnand %p517_p13, %p511_p10 }
 0x47c   :  { %521 = shalt.err (!%p518_p0)
}
 0x47d   :  { %s522_s5 = scalar_lea.hbm %s706_s9, 128 }
 0x47e   :  { %p523_p1 = scmp.ne.s32.totalorder %s706_s9, %s522_s5  ;;  %p526_p2 = scmp.lt.u32.totalorder %s522_s5, %s706_s9 }
 0x480   :  { %p528_p3 = pnand %p526_p2, %p523_p1 }
 0x482   :  { %531 = shalt.err (!%p528_p3)
}
 0x483   :  { %357 = dma.vmem_to_hbm [thread:$0]  %s355_s11, 128, %s706_s9, [#allocation7]  }
 0x484   :  { %534 = dma.done.wait [#allocation4], 128  }
 0x485   :  { %535 = vsyncadd [#allocation4], 4294967168 }
 0x486   :  { %536 = dma.done.wait [#allocation7], 256  }
 0x487   :  { %537 = vsyncadd [#allocation7], 4294967040 }
 0x488   :  { %367 = vsyncpa [#allocation3], 1 }
 0x489   :  { %368 = vsyncpa [#allocation4], 1 }
 0x48a   :  { %369 = vsyncpa [#allocation7], 1 }

</bundles_post_ra>
